<compile_context>
chip_gen: v6e
topology: v6e:2x2x1
jax: 0.10.0
libtpu: 0.0.40
codegen_flags: <defaults>
</compile_context>

<pallas_src>
import functools

import jax
import jax.numpy as jnp
from jax.experimental import pallas as pl
from jax.experimental.pallas import tpu as pltpu

LANE = 128            # TPU lane width
SUBLANE = 8
MAX_TILE_ROWS = 8192  # 8192 x 128 x 4 B = 4 MiB per f32 input block


def _cdiv(a, b):
    return -(-a // b)


@functools.lru_cache(maxsize=1)
def _chip_config():
    """(num_tensorcores, vmem_limit_bytes) for the current TPU, safe fallbacks."""
    kind = ""
    try:
        kind = jax.devices()[0].device_kind.lower()
    except Exception:
        pass
    vmem_cap = 128 * 1024 * 1024
    try:
        info = pltpu.get_tpu_info()
        vmem_cap = int(getattr(info, "vmem_capacity_bytes", vmem_cap))
    except Exception:
        pass
    num_cores = 2 if "v7" in kind else 1          # v7x: 2 TCs/chip; v5e/v6e: 1
    if vmem_cap <= 64 * 1024 * 1024:              # v7x: leave ample headroom
        vmem_limit = 40 * 1024 * 1024
    else:                                         # v5e/v6e: 128 MiB physical
        vmem_limit = 64 * 1024 * 1024
    return num_cores, vmem_limit


def _dice_partial_kernel(x_ref, t_ref, o_ref, acc_i_ref, acc_p_ref, acc_t_ref,
                         *, tiles_per_split, num_row_tiles, tile_rows, rows):
    """Per-split partial sums of (sigmoid(x)*t, sigmoid(x), t).

    Grid = (num_splits, tiles_per_split). Each split owns a contiguous range of
    row tiles and keeps (8, 128) running sums in VMEM (pure vadds, hidden under
    the streaming DMA). The split's last step dumps its raw accumulators to the
    lane-dense output; the tiny cross-lane reduction happens in the wrapper.
    """
    c = pl.program_id(0)            # split index (one TensorCore each on v7x)
    j = pl.program_id(1)            # row-tile index within the split
    g = c * tiles_per_split + j     # global row-tile index (may overshoot)

    @pl.when(j == 0)
    def _init():
        acc_i_ref[...] = jnp.zeros_like(acc_i_ref)
        acc_p_ref[...] = jnp.zeros_like(acc_p_ref)
        acc_t_ref[...] = jnp.zeros_like(acc_t_ref)

    groups = tile_rows // SUBLANE   # static; tile_rows is a multiple of 8

    def load():
        p = jax.nn.sigmoid(x_ref[...].astype(jnp.float32))  # already in [0, 1]
        t = t_ref[...].astype(jnp.float32)
        return p, t

    def accumulate(p, t):
        # (tile_rows, 128) -> (groups, 8, 128) is a no-op regrouping of
        # (8, 128) vreg tiles; sum over the leading axis stays on the VPU.
        acc_i_ref[...] += jnp.sum((p * t).reshape(groups, SUBLANE, LANE), axis=0)
        acc_p_ref[...] += jnp.sum(p.reshape(groups, SUBLANE, LANE), axis=0)
        acc_t_ref[...] += jnp.sum(t.reshape(groups, SUBLANE, LANE), axis=0)

    ragged = (rows % tile_rows) != 0   # static
    if not ragged:
        @pl.when(g < num_row_tiles)     # skip overshoot steps of an uneven split
        def _accumulate_all():
            p, t = load()
            accumulate(p, t)
    else:
        # Fast (unmasked) path for every tile except the last global one.
        @pl.when(g < num_row_tiles - 1)
        def _accumulate_fast():
            p, t = load()
            accumulate(p, t)

        # Masked path runs exactly once: the ragged last tile. The block reads
        # past the array; jnp.where (a select) discards any NaN/Inf garbage.
        @pl.when(g == num_row_tiles - 1)
        def _accumulate_last_masked():
            p, t = load()
            valid_rows = rows - (num_row_tiles - 1) * tile_rows   # static
            rid = jax.lax.broadcasted_iota(jnp.int32, (tile_rows, LANE), 0)
            valid = rid < valid_rows
            p = jnp.where(valid, p, 0.0)
            t = jnp.where(valid, t, 0.0)
            accumulate(p, t)

    @pl.when(j == tiles_per_split - 1)
    def _finalize():
        o_ref[0, 0] = acc_i_ref[...]
        o_ref[0, 1] = acc_p_ref[...]
        o_ref[0, 2] = acc_t_ref[...]


def dice_loss(inputs, targets, smooth=1.0):
    """Pallas DiceLoss forward. inputs/targets: any shape (e.g. [B, C, H, W])."""
    x = inputs.reshape(-1)
    t = targets.reshape(-1)
    # Stream original dtypes (kernel upcasts); only fix dtypes Mosaic can't load well.
    if not jnp.issubdtype(x.dtype, jnp.floating):
        x = x.astype(jnp.float32)
    if t.dtype == jnp.bool_:
        t = t.astype(jnp.int8)      # 1 byte/elem, avoids 1-bit loads in-kernel

    n = x.shape[0]
    if n == 0:
        return jnp.float32(0.0)     # dice == smooth / smooth == 1

    # Rare fallback: pad so the flat size is a multiple of 8*128, letting us view
    # data as (rows, 128) with rows % 8 == 0. sigmoid(-inf) == 0 and target pad
    # == 0, so padding contributes nothing. Typical mask shapes skip this.
    chunk = LANE * SUBLANE
    if n % chunk != 0:
        pad = chunk - n % chunk
        x = jnp.pad(x, (0, pad), constant_values=-jnp.inf)
        t = jnp.pad(t, (0, pad), constant_values=0)

    rows = x.shape[0] // LANE
    x2 = x.reshape(rows, LANE)
    t2 = t.reshape(rows, LANE)

    num_cores, vmem_limit = _chip_config()

    tile_rows = rows if rows <= MAX_TILE_ROWS else MAX_TILE_ROWS
    num_row_tiles = _cdiv(rows, tile_rows)
    num_splits = 2 if (num_cores >= 2 and num_row_tiles >= 2) else 1
    tiles_per_split = _cdiv(num_row_tiles, num_splits)

    def in_map(c, j):
        g = c * tiles_per_split + j
        return (jnp.minimum(g, num_row_tiles - 1), 0)   # clamp overshoot steps

    kernel = functools.partial(
        _dice_partial_kernel,
        tiles_per_split=tiles_per_split,
        num_row_tiles=num_row_tiles,
        tile_rows=tile_rows,
        rows=rows,
    )

    partials = pl.pallas_call(
        kernel,
        out_shape=jax.ShapeDtypeStruct((num_splits, 3, SUBLANE, LANE), jnp.float32),
        grid_spec=pltpu.PrefetchScalarGridSpec(
            num_scalar_prefetch=0,
            grid=(num_splits, tiles_per_split),
            in_specs=[
                pl.BlockSpec((tile_rows, LANE), in_map),
                pl.BlockSpec((tile_rows, LANE), in_map),
            ],
            out_specs=pl.BlockSpec((1, 3, SUBLANE, LANE), lambda c, j: (c, 0, 0, 0)),
            scratch_shapes=[
                pltpu.VMEM((SUBLANE, LANE), jnp.float32),
                pltpu.VMEM((SUBLANE, LANE), jnp.float32),
                pltpu.VMEM((SUBLANE, LANE), jnp.float32),
            ],
        ),
        compiler_params=pltpu.CompilerParams(
            dimension_semantics=("parallel", "arbitrary"),
            vmem_limit_bytes=vmem_limit,
        ),
    )(x2, t2)

    # Tiny final reduction (num_splits * 3 * 8 * 128 floats) in the wrapper.
    inter = jnp.sum(partials[:, 0])
    psum = jnp.sum(partials[:, 1])
    tsum = jnp.sum(partials[:, 2])
    dice = (2.0 * inter + jnp.float32(smooth)) / (psum + tsum + jnp.float32(smooth))
    return (1.0 - dice).astype(jnp.float32)


def dice_loss_ref(inputs, targets, smooth=1.0):
    """Pure-JAX reference matching the PyTorch module."""
    p = jnp.clip(jax.nn.sigmoid(inputs.astype(jnp.float32)), 0.0, 1.0).reshape(-1)
    t = targets.astype(jnp.float32).reshape(-1)
    inter = jnp.sum(p * t)
    dice = (2.0 * inter + smooth) / (jnp.sum(p) + jnp.sum(t) + smooth)
    return 1.0 - dice


if __name__ == "__main__":
    key = jax.random.PRNGKey(0)
    k1, k2, k3, k4 = jax.random.split(key, 4)

    loss_fn = jax.jit(functools.partial(dice_loss, smooth=1.0))

    # Small NCHW logits + binary mask targets, consistent with a segmentation loss.
    B, C, H, W = 2, 4, 16, 16
    logits = jax.random.normal(k1, (B, C, H, W), dtype=jnp.float32) * 2.0
    targets = (jax.random.uniform(k2, (B, C, H, W)) > 0.5).astype(jnp.float32)

    loss = jax.block_until_ready(loss_fn(logits, targets))
    ref = dice_loss_ref(logits, targets, smooth=1.0)
    assert jnp.allclose(loss, ref, atol=1e-5, rtol=1e-5), (loss, ref)

    # Odd-sized input: exercises the wrapper-side pad-to-(8*128) fallback.
    logits2 = jax.random.normal(k3, (3, 5, 7), dtype=jnp.float32)
    targets2 = (jax.random.uniform(k4, (3, 5, 7)) > 0.5).astype(jnp.float32)
    loss2 = jax.block_until_ready(loss_fn(logits2, targets2))
    ref2 = dice_loss_ref(logits2, targets2, smooth=1.0)
    assert jnp.allclose(loss2, ref2, atol=1e-5, rtol=1e-5), (loss2, ref2)

    print("KERNEL_OK")
</pallas_src>

<mosaic_0001>
module attributes {stable_mosaic.version = 11 : i64} {
  func.func @_dice_partial_kernel(%arg0: i32, %arg1: i32, %arg2: memref<16x128xf32, #tpu.memory_space<vmem>>, %arg3: memref<16x128xf32, #tpu.memory_space<vmem>>, %arg4: memref<1x3x8x128xf32, #tpu.memory_space<vmem>>, %arg5: memref<8x128xf32, #tpu.memory_space<vmem>>, %arg6: memref<8x128xf32, #tpu.memory_space<vmem>>, %arg7: memref<8x128xf32, #tpu.memory_space<vmem>>) attributes {dimension_semantics = [#tpu.dimension_semantics<parallel>, #tpu.dimension_semantics<arbitrary>], iteration_bounds = array<i64: 1, 1>, scalar_prefetch = 0 : i64, scratch_operands = 3 : i64, tpu.core_type = #tpu.core_type<tc>, window_params = [{transform_indices = @transform_0, window_bounds = array<i64: 16, 128>}, {transform_indices = @transform_1, window_bounds = array<i64: 16, 128>}, {transform_indices = @transform_2, window_bounds = array<i64: 1, 3, 8, 128>}]} {
    %c1_i32 = arith.constant 1 : i32
    %0 = arith.muli %arg0, %c1_i32 : i32
    %1 = arith.addi %0, %arg1 : i32
    %c0_i32 = arith.constant 0 : i32
    %2 = arith.cmpi eq, %arg1, %c0_i32 : i32
    %3 = arith.extui %2 : i1 to i32
    %c0_i32_0 = arith.constant 0 : i32
    %4 = arith.cmpi ne, %3, %c0_i32_0 : i32
    scf.if %4 {
      %cst = arith.constant 0.000000e+00 : f32
      %11 = vector.broadcast %cst : f32 to vector<8x128xf32>
      %c0 = arith.constant 0 : index
      %c0_5 = arith.constant 0 : index
      %12 = vector.load %arg5[%c0, %c0_5] : memref<8x128xf32, #tpu.memory_space<vmem>>, vector<8x128xf32>
      tpu.vector_store %arg5[%c0, %c0_5], %11 {strides = array<i32>} : memref<8x128xf32, #tpu.memory_space<vmem>>, vector<8x128xf32>,
      %cst_6 = arith.constant 0.000000e+00 : f32
      %13 = vector.broadcast %cst_6 : f32 to vector<8x128xf32>
      %c0_7 = arith.constant 0 : index
      %c0_8 = arith.constant 0 : index
      %14 = vector.load %arg6[%c0_7, %c0_8] : memref<8x128xf32, #tpu.memory_space<vmem>>, vector<8x128xf32>
      tpu.vector_store %arg6[%c0_7, %c0_8], %13 {strides = array<i32>} : memref<8x128xf32, #tpu.memory_space<vmem>>, vector<8x128xf32>,
      %cst_9 = arith.constant 0.000000e+00 : f32
      %15 = vector.broadcast %cst_9 : f32 to vector<8x128xf32>
      %c0_10 = arith.constant 0 : index
      %c0_11 = arith.constant 0 : index
      %16 = vector.load %arg7[%c0_10, %c0_11] : memref<8x128xf32, #tpu.memory_space<vmem>>, vector<8x128xf32>
      tpu.vector_store %arg7[%c0_10, %c0_11], %15 {strides = array<i32>} : memref<8x128xf32, #tpu.memory_space<vmem>>, vector<8x128xf32>,
    } else {
    }
    %c1_i32_1 = arith.constant 1 : i32
    %5 = arith.cmpi slt, %1, %c1_i32_1 : i32
    %6 = arith.extui %5 : i1 to i32
    %c0_i32_2 = arith.constant 0 : i32
    %7 = arith.cmpi ne, %6, %c0_i32_2 : i32
    scf.if %7 {
      %c0 = arith.constant 0 : index
      %c0_5 = arith.constant 0 : index
      %11 = vector.load %arg2[%c0, %c0_5] : memref<16x128xf32, #tpu.memory_space<vmem>>, vector<16x128xf32>
      %12 = arith.negf %11 : vector<16x128xf32>
      %13 = math.exp %12 : vector<16x128xf32>
      %cst = arith.constant 1.000000e+00 : f32
      %14 = vector.broadcast %cst : f32 to vector<16x128xf32>
      %15 = arith.addf %14, %13 : vector<16x128xf32>
      %16 = arith.divf %14, %15 : vector<16x128xf32>
      %c0_6 = arith.constant 0 : index
      %c0_7 = arith.constant 0 : index
      %17 = vector.load %arg3[%c0_6, %c0_7] : memref<16x128xf32, #tpu.memory_space<vmem>>, vector<16x128xf32>
      %c0_8 = arith.constant 0 : index
      %c0_9 = arith.constant 0 : index
      %18 = vector.load %arg5[%c0_8, %c0_9] : memref<8x128xf32, #tpu.memory_space<vmem>>, vector<8x128xf32>
      %19 = arith.mulf %16, %17 : vector<16x128xf32>
      %20 = vector.shape_cast %19 : vector<16x128xf32> to vector<2x8x128xf32>
      %cst_10 = arith.constant dense<0.000000e+00> : vector<8x128xf32>
      %21 = vector.multi_reduction <add>, %20, %cst_10 [0] : vector<2x8x128xf32> to vector<8x128xf32>
      %22 = arith.addf %18, %21 : vector<8x128xf32>
      %c0_11 = arith.constant 0 : index
      %c0_12 = arith.constant 0 : index
      %23 = vector.load %arg5[%c0_11, %c0_12] : memref<8x128xf32, #tpu.memory_space<vmem>>, vector<8x128xf32>
      tpu.vector_store %arg5[%c0_11, %c0_12], %22 {strides = array<i32>} : memref<8x128xf32, #tpu.memory_space<vmem>>, vector<8x128xf32>,
      %c0_13 = arith.constant 0 : index
      %c0_14 = arith.constant 0 : index
      %24 = vector.load %arg6[%c0_13, %c0_14] : memref<8x128xf32, #tpu.memory_space<vmem>>, vector<8x128xf32>
      %25 = vector.shape_cast %16 : vector<16x128xf32> to vector<2x8x128xf32>
      %cst_15 = arith.constant dense<0.000000e+00> : vector<8x128xf32>
      %26 = vector.multi_reduction <add>, %25, %cst_15 [0] : vector<2x8x128xf32> to vector<8x128xf32>
      %27 = arith.addf %24, %26 : vector<8x128xf32>
      %c0_16 = arith.constant 0 : index
      %c0_17 = arith.constant 0 : index
      %28 = vector.load %arg6[%c0_16, %c0_17] : memref<8x128xf32, #tpu.memory_space<vmem>>, vector<8x128xf32>
      tpu.vector_store %arg6[%c0_16, %c0_17], %27 {strides = array<i32>} : memref<8x128xf32, #tpu.memory_space<vmem>>, vector<8x128xf32>,
      %c0_18 = arith.constant 0 : index
      %c0_19 = arith.constant 0 : index
      %29 = vector.load %arg7[%c0_18, %c0_19] : memref<8x128xf32, #tpu.memory_space<vmem>>, vector<8x128xf32>
      %30 = vector.shape_cast %17 : vector<16x128xf32> to vector<2x8x128xf32>
      %cst_20 = arith.constant dense<0.000000e+00> : vector<8x128xf32>
      %31 = vector.multi_reduction <add>, %30, %cst_20 [0] : vector<2x8x128xf32> to vector<8x128xf32>
      %32 = arith.addf %29, %31 : vector<8x128xf32>
      %c0_21 = arith.constant 0 : index
      %c0_22 = arith.constant 0 : index
      %33 = vector.load %arg7[%c0_21, %c0_22] : memref<8x128xf32, #tpu.memory_space<vmem>>, vector<8x128xf32>
      tpu.vector_store %arg7[%c0_21, %c0_22], %32 {strides = array<i32>} : memref<8x128xf32, #tpu.memory_space<vmem>>, vector<8x128xf32>,
    } else {
    }
    %c0_i32_3 = arith.constant 0 : i32
    %8 = arith.cmpi eq, %arg1, %c0_i32_3 : i32
    %9 = arith.extui %8 : i1 to i32
    %c0_i32_4 = arith.constant 0 : i32
    %10 = arith.cmpi ne, %9, %c0_i32_4 : i32
    scf.if %10 {
      %c0 = arith.constant 0 : index
      %c0_5 = arith.constant 0 : index
      %11 = vector.load %arg5[%c0, %c0_5] : memref<8x128xf32, #tpu.memory_space<vmem>>, vector<8x128xf32>
      %c0_6 = arith.constant 0 : index
      %c0_7 = arith.constant 0 : index
      %c0_8 = arith.constant 0 : index
      %c0_9 = arith.constant 0 : index
      %12 = vector.load %arg4[%c0_6, %c0_7, %c0_8, %c0_9] : memref<1x3x8x128xf32, #tpu.memory_space<vmem>>, vector<1x1x8x128xf32>
      %13 = vector.shape_cast %12 : vector<1x1x8x128xf32> to vector<8x128xf32>
      %14 = vector.shape_cast %11 : vector<8x128xf32> to vector<1x1x8x128xf32>
      tpu.vector_store %arg4[%c0_6, %c0_7, %c0_8, %c0_9], %14 {strides = array<i32>} : memref<1x3x8x128xf32, #tpu.memory_space<vmem>>, vector<1x1x8x128xf32>,
      %c0_10 = arith.constant 0 : index
      %c0_11 = arith.constant 0 : index
      %15 = vector.load %arg6[%c0_10, %c0_11] : memref<8x128xf32, #tpu.memory_space<vmem>>, vector<8x128xf32>
      %c0_12 = arith.constant 0 : index
      %c1 = arith.constant 1 : index
      %c0_13 = arith.constant 0 : index
      %c0_14 = arith.constant 0 : index
      %16 = vector.load %arg4[%c0_12, %c1, %c0_13, %c0_14] : memref<1x3x8x128xf32, #tpu.memory_space<vmem>>, vector<1x1x8x128xf32>
      %17 = vector.shape_cast %16 : vector<1x1x8x128xf32> to vector<8x128xf32>
      %18 = vector.shape_cast %15 : vector<8x128xf32> to vector<1x1x8x128xf32>
      tpu.vector_store %arg4[%c0_12, %c1, %c0_13, %c0_14], %18 {strides = array<i32>} : memref<1x3x8x128xf32, #tpu.memory_space<vmem>>, vector<1x1x8x128xf32>,
      %c0_15 = arith.constant 0 : index
      %c0_16 = arith.constant 0 : index
      %19 = vector.load %arg7[%c0_15, %c0_16] : memref<8x128xf32, #tpu.memory_space<vmem>>, vector<8x128xf32>
      %c0_17 = arith.constant 0 : index
      %c2 = arith.constant 2 : index
      %c0_18 = arith.constant 0 : index
      %c0_19 = arith.constant 0 : index
      %20 = vector.load %arg4[%c0_17, %c2, %c0_18, %c0_19] : memref<1x3x8x128xf32, #tpu.memory_space<vmem>>, vector<1x1x8x128xf32>
      %21 = vector.shape_cast %20 : vector<1x1x8x128xf32> to vector<8x128xf32>
      %22 = vector.shape_cast %19 : vector<8x128xf32> to vector<1x1x8x128xf32>
      tpu.vector_store %arg4[%c0_17, %c2, %c0_18, %c0_19], %22 {strides = array<i32>} : memref<1x3x8x128xf32, #tpu.memory_space<vmem>>, vector<1x1x8x128xf32>,
    } else {
    }
    return
  }
  func.func @transform_0(%arg0: i32, %arg1: i32) -> (i32, i32) {
    %c1_i32 = arith.constant 1 : i32
    %0 = arith.muli %arg0, %c1_i32 : i32
    %1 = arith.addi %0, %arg1 : i32
    %c0_i32 = arith.constant 0 : i32
    %2 = arith.minsi %1, %c0_i32 : i32
    %c0_i32_0 = arith.constant 0 : i32
    %c0_i32_1 = arith.constant 0 : i32
    return %2, %c0_i32_0 : i32, i32
  }
  func.func @transform_1(%arg0: i32, %arg1: i32) -> (i32, i32) {
    %c1_i32 = arith.constant 1 : i32
    %0 = arith.muli %arg0, %c1_i32 : i32
    %1 = arith.addi %0, %arg1 : i32
    %c0_i32 = arith.constant 0 : i32
    %2 = arith.minsi %1, %c0_i32 : i32
    %c0_i32_0 = arith.constant 0 : i32
    %c0_i32_1 = arith.constant 0 : i32
    return %2, %c0_i32_0 : i32, i32
  }
  func.func @transform_2(%arg0: i32, %arg1: i32) -> (i32, i32, i32, i32) {
    %c0_i32 = arith.constant 0 : i32
    %c0_i32_0 = arith.constant 0 : i32
    %c0_i32_1 = arith.constant 0 : i32
    %c0_i32_2 = arith.constant 0 : i32
    return %arg0, %c0_i32, %c0_i32_0, %c0_i32_1 : i32, i32, i32, i32
  }
}

</mosaic_0001>

<bundles_post_ra>
// kernel: dice_loss.1
= control target key start
LH: loop header
LB: loop body
LE: loop exit
PB: predicated region body
PF: predicated region fallthrough
CT: control target
= control target key end

     0   :  { %s192_s0 = inlined_call_operand.vmem [shape: f32[16,128], index: 0, kind: input, shape index: {}]   ;;  %s193_s1 = inlined_call_operand.vmem [shape: f32[16,128], index: 1, kind: input, shape index: {}]   ;;  %s194_s2 = inlined_call_operand.vmem [shape: f32[1,3,8,128], index: 2, kind: output, shape index: {}]  }
   0x1   :  { %v87_v0 = vld [vmem:[%s192_s0] sm:$0xff]  ;;  %v88_v1 = vld [vmem:[%s192_s0 + $0x8] sm:$0xff] }
   0x2   :  { %v144_v2 = vmul.f32 -1.442695, %v87_v0  ;;  %v145_v3 = vmul.f32 -1.442695, %v88_v1  ;;  %v101_v4 = vld [vmem:[%s193_s1] sm:$0xff]  ;;  %v102_v5 = vld [vmem:[%s193_s1 + $0x8] sm:$0xff] }
   0x3   :  { %v114_v6 = vadd.f32 %v102_v5, %v101_v4 }
   0x4   :  { %148 = vpow2.f32 %v144_v2 }
   0x5   :  { %150 = vpow2.f32 %v145_v3  ;;  %147 = vst [vmem:[%s194_s2 + $0x10] sm:$0xff] %v114_v6 }
  0x11   :  { %v149_v7 = vpop.eup %148 }
  0x12   :  { %v151_v8 = vpop.eup %150  ;;  %v95_v9 = vadd.f32 1.0, %v149_v7 }
  0x13   :  { %v96_v10 = vadd.f32 1.0, %v151_v8 }
  0x14   :  { %152 = vrcp.f32 %v95_v9 }
  0x15   :  { %154 = vrcp.f32 %v96_v10 }
  0x21   :  { %v153_v11 = vpop.eup %152 }
  0x22   :  { %v155_v12 = vpop.eup %154  ;;  %v104_v13 = vmul.f32 %v153_v11, %v101_v4 }
  0x23   :  { %v105_v14 = vmul.f32 %v155_v12, %v102_v5  ;;  %v110_v15 = vadd.f32 %v155_v12, %v153_v11 }
  0x25   :  { %v106_v16 = vadd.f32 %v105_v14, %v104_v13  ;;  %146 = vst [vmem:[%s194_s2 + $0x8] sm:$0xff] %v110_v15 }
  0x27   :  { %121 = vst [vmem:[%s194_s2] sm:$0xff] %v106_v16 }

</bundles_post_ra>
